<compile_context>
chip_gen: v7x
topology: tpu7x:2x2x1
jax: 0.10.0
libtpu: 0.0.40
codegen_flags: <defaults>
</compile_context>

<pallas_src>
import functools
import math

import jax
import jax.numpy as jnp
from jax import lax
from jax.experimental import pallas as pl
from jax.experimental.pallas import tpu as pltpu


_VMEM_DEFAULT = 48 * 1024 * 1024  # safe on every generation (v7x has 64 MiB / TC)


# ------------------------------ tiling helpers ------------------------------

def _sublane_align(dtype):
    """Sublane packing granularity: 8 for f32, 16 for bf16/f16, 32 for int8/fp8."""
    return max(8, 32 // jnp.dtype(dtype).itemsize)


def _pick_tile(dim, target, align):
    """Largest tile <= target that divides `dim` and is a multiple of `align`.
    Returns `dim` itself when dim <= target (full-dim blocks are always legal).
    Returns None when no such tile exists (caller pads or uses the full dim)."""
    if dim <= target:
        return dim
    t = (target // align) * align
    while t >= align:
        if dim % t == 0:
            return t
        t -= align
    return None


def _matmul_row_tiling(M, target, align):
    """Row-tile for the matmul M dimension.  If no aligned divisor exists, return the
    target tile and a padded row count (caller zero-pads rows and slices the result)."""
    tm = _pick_tile(M, target, align)
    if tm is not None:
        return tm, M
    tm = max(align, (target // align) * align)
    return tm, ((M + tm - 1) // tm) * tm


def _heads_per_block(num_heads, head_dim):
    """Number of heads packed per flash block so the lane width is a multiple of 128."""
    if head_dim % 128 == 0:
        return 1
    g = 128 // math.gcd(head_dim, 128)
    if g <= num_heads and num_heads % g == 0:
        return g
    return num_heads  # fall back to all heads (block spans the full channel dim -> legal)


def _tuning():
    """Per-generation tile / VMEM-limit defaults (best effort; safe fallback)."""
    try:
        kind = jax.devices()[0].device_kind.lower()
    except Exception:
        kind = ""
    if "v5" in kind or "v6" in kind:
        # 128 MiB VMEM, lower HBM BW: bigger q/m tiles cut K/V and x re-streaming.
        return dict(vmem_limit=96 * 1024 * 1024, tq_t=512, tkv_t=512, tm_t=512)
    # v7x (64 MiB VMEM / TC, 3.2 TB/s HBM) and unknown chips: conservative tiles.
    return dict(vmem_limit=_VMEM_DEFAULT, tq_t=256, tkv_t=512, tm_t=256)


# ----------------------------- Pallas kernels -----------------------------

def _qkv_kernel(x_ref, wq_ref, wk_ref, wv_ref, q_ref, k_ref, v_ref,
                qacc, kacc, vacc, *, scale):
    """Tiled x @ [wq|wk|wv] with f32 accumulators; K is the reduction grid axis (2).
    The attention scale is folded into the q output in the finalize branch."""
    kstep = pl.program_id(2)

    @pl.when(kstep == 0)
    def _():
        qacc[...] = jnp.zeros_like(qacc)
        kacc[...] = jnp.zeros_like(kacc)
        vacc[...] = jnp.zeros_like(vacc)

    x = x_ref[...]  # native dtype MXU operands, f32 accumulation
    qacc[...] += jnp.dot(x, wq_ref[...], preferred_element_type=jnp.float32)
    kacc[...] += jnp.dot(x, wk_ref[...], preferred_element_type=jnp.float32)
    vacc[...] += jnp.dot(x, wv_ref[...], preferred_element_type=jnp.float32)

    @pl.when(kstep == pl.num_programs(2) - 1)
    def _():
        q_ref[...] = (qacc[...] * scale).astype(q_ref.dtype)  # q * scale folded here
        k_ref[...] = kacc[...].astype(k_ref.dtype)
        v_ref[...] = vacc[...].astype(v_ref.dtype)


def _linear_bias_kernel(x_ref, w_ref, b_ref, o_ref, acc_ref):
    """Tiled x @ w + b with f32 accumulator; K is the reduction grid axis (2)."""
    kstep = pl.program_id(2)

    @pl.when(kstep == 0)
    def _():
        acc_ref[...] = jnp.zeros_like(acc_ref)

    acc_ref[...] += jnp.dot(x_ref[...], w_ref[...], preferred_element_type=jnp.float32)

    @pl.when(kstep == pl.num_programs(2) - 1)
    def _():
        o_ref[...] = (acc_ref[...] + b_ref[...].astype(jnp.float32)).astype(o_ref.dtype)


def _flash_attn_kernel(q_ref, k_ref, v_ref, o_ref, m_sc, l_sc, acc_sc, *,
                       heads_per_block, head_dim):
    """Flash attention on a group of `heads_per_block` heads stored as contiguous channel
    columns.  Grid: (batch, head_group, q_tile, kv_tile); kv is the reduction axis (3).
    q/k/v/o blocks are (1, tile, heads_per_block*head_dim) — lane-dense when G*D >= 128.
    m/l scratches hold the per-head running stats broadcast across that head's D lanes so
    the finalize is a single lane-dense store."""
    ki = pl.program_id(3)

    @pl.when(ki == 0)
    def _():
        m_sc[...] = jnp.full_like(m_sc, -jnp.inf)
        l_sc[...] = jnp.zeros_like(l_sc)
        acc_sc[...] = jnp.zeros_like(acc_sc)

    q = q_ref[0]   # (tq,  G*D)   scale already folded into the qkv projection
    k = k_ref[0]   # (tkv, G*D)
    v = v_ref[0]   # (tkv, G*D)

    # Static unroll over the (small) head group: block-diagonal attention per head.
    for g in range(heads_per_block):
        lo = g * head_dim
        hi = lo + head_dim
        qg = q[:, lo:hi]               # (tq,  D)
        kg = k[:, lo:hi]               # (tkv, D)
        vg = v[:, lo:hi]               # (tkv, D)

        # s = q @ k^T without materializing k.T: contract the D dims directly.
        # TODO(synk): optional bf16 cast of qg/kg here for f32 models on v6e/v7x MXU.
        s = lax.dot_general(qg, kg, (((1,), (1,)), ((), ())),
                            preferred_element_type=jnp.float32)       # (tq, tkv) f32

        m_prev = m_sc[:, lo:hi]                                       # (tq, D), lanes equal
        m_new = jnp.maximum(m_prev, jnp.max(s, axis=-1, keepdims=True))
        alpha = jnp.exp(m_prev - m_new)                               # (tq, D)
        p = jnp.exp(s - m_new[:, 0:1])                                # (tq, tkv) f32
        l_sc[:, lo:hi] = alpha * l_sc[:, lo:hi] + jnp.sum(p, axis=-1, keepdims=True)
        acc_sc[:, lo:hi] = alpha * acc_sc[:, lo:hi] + lax.dot_general(
            p.astype(vg.dtype), vg, (((1,), (0,)), ((), ())),
            preferred_element_type=jnp.float32)                       # (tq, D)
        m_sc[:, lo:hi] = m_new

    @pl.when(ki == pl.num_programs(3) - 1)
    def _():
        # Exact divide: runs once per q tile on the accumulator — free accuracy.
        # Single lane-dense store of the whole head group.
        o_ref[0] = (acc_sc[...] / l_sc[...]).astype(o_ref.dtype)


# ------------------------------ wrappers -----------------------------------

def qkv_proj_pallas(x2d, wq, wk, wv, scale, *, tm_t=256, tn_t=256, tk_t=512,
                    vmem_limit=_VMEM_DEFAULT):
    """x2d: (M, K); wq/wk/wv: (K, C). Returns (q*scale, k, v), each (M, C)."""
    M0, K = x2d.shape
    Nout = wq.shape[1]
    align = _sublane_align(x2d.dtype)
    tm, Mp = _matmul_row_tiling(M0, tm_t, align)
    if Mp != M0:
        x2d = jnp.pad(x2d, ((0, Mp - M0), (0, 0)))
    tn = _pick_tile(Nout, tn_t, 128) or Nout
    tk = _pick_tile(K, tk_t, 128) or K
    grid = (Mp // tm, Nout // tn, K // tk)

    x_spec = pl.BlockSpec((tm, tk), lambda i, j, k: (i, k))
    w_spec = pl.BlockSpec((tk, tn), lambda i, j, k: (k, j))
    o_spec = pl.BlockSpec((tm, tn), lambda i, j, k: (i, j))
    out_sh = jax.ShapeDtypeStruct((Mp, Nout), x2d.dtype)

    q2d, k2d, v2d = pl.pallas_call(
        functools.partial(_qkv_kernel, scale=scale),
        out_shape=(out_sh, out_sh, out_sh),
        grid=grid,
        in_specs=[x_spec, w_spec, w_spec, w_spec],
        out_specs=(o_spec, o_spec, o_spec),
        scratch_shapes=[pltpu.VMEM((tm, tn), jnp.float32) for _ in range(3)],
        compiler_params=pltpu.CompilerParams(
            dimension_semantics=("parallel", "parallel", "arbitrary"),
            vmem_limit_bytes=vmem_limit),
    )(x2d, wq, wk, wv)

    if Mp != M0:
        q2d, k2d, v2d = q2d[:M0], k2d[:M0], v2d[:M0]
    return q2d, k2d, v2d


def linear_bias_pallas(x2d, w, b, *, tm_t=256, tn_t=256, tk_t=512,
                       vmem_limit=_VMEM_DEFAULT):
    """x2d: (M, K), w: (K, Nout), b: (Nout,) -> (M, Nout)."""
    M0, K = x2d.shape
    Nout = w.shape[1]
    align = _sublane_align(x2d.dtype)
    tm, Mp = _matmul_row_tiling(M0, tm_t, align)
    if Mp != M0:
        x2d = jnp.pad(x2d, ((0, Mp - M0), (0, 0)))
    tn = _pick_tile(Nout, tn_t, 128) or Nout
    tk = _pick_tile(K, tk_t, 128) or K
    grid = (Mp // tm, Nout // tn, K // tk)
    b2 = b.reshape(1, Nout)

    out = pl.pallas_call(
        _linear_bias_kernel,
        out_shape=jax.ShapeDtypeStruct((Mp, Nout), x2d.dtype),
        grid=grid,
        in_specs=[
            pl.BlockSpec((tm, tk), lambda i, j, k: (i, k)),
            pl.BlockSpec((tk, tn), lambda i, j, k: (k, j)),
            pl.BlockSpec((1, tn), lambda i, j, k: (0, j)),
        ],
        out_specs=pl.BlockSpec((tm, tn), lambda i, j, k: (i, j)),
        scratch_shapes=[pltpu.VMEM((tm, tn), jnp.float32)],
        compiler_params=pltpu.CompilerParams(
            dimension_semantics=("parallel", "parallel", "arbitrary"),
            vmem_limit_bytes=vmem_limit),
    )(x2d, w, b2)

    if Mp != M0:
        out = out[:M0]
    return out


def flash_attention(q, k, v, num_heads, *, tq_t=256, tkv_t=512,
                    vmem_limit=_VMEM_DEFAULT):
    """q, k, v: (B, N, C) with heads as channel groups; softmax((q)(k)^T) v per head.
    (q is already scaled.)  Output is (B, N, C) in the same channel layout."""
    B, N, C = q.shape
    D = C // num_heads
    G = _heads_per_block(num_heads, D)
    gw = G * D  # lane width of every block (multiple of 128 or the full channel dim)

    align = _sublane_align(q.dtype)
    # TODO(synk): masked kv tails instead of the full-dim fallback when N has no aligned divisor.
    tq = _pick_tile(N, tq_t, align) or N
    tkv = _pick_tile(N, tkv_t, align) or N
    grid = (B, num_heads // G, N // tq, N // tkv)

    q_spec = pl.BlockSpec((1, tq, gw), lambda b, hg, qi, ki: (b, qi, hg))
    # (v5e tuning knob: pipeline_mode=pl.Buffered(3) on the kv spec if its DMA is exposed.)
    kv_spec = pl.BlockSpec((1, tkv, gw), lambda b, hg, qi, ki: (b, ki, hg))
    o_spec = pl.BlockSpec((1, tq, gw), lambda b, hg, qi, ki: (b, qi, hg))

    return pl.pallas_call(
        functools.partial(_flash_attn_kernel, heads_per_block=G, head_dim=D),
        out_shape=jax.ShapeDtypeStruct((B, N, C), q.dtype),
        grid=grid,
        in_specs=[q_spec, kv_spec, kv_spec],
        out_specs=o_spec,
        scratch_shapes=[
            pltpu.VMEM((tq, gw), jnp.float32),  # running max  m (broadcast across head lanes)
            pltpu.VMEM((tq, gw), jnp.float32),  # running sum  l (broadcast across head lanes)
            pltpu.VMEM((tq, gw), jnp.float32),  # output accumulator
        ],
        compiler_params=pltpu.CompilerParams(
            dimension_semantics=("parallel", "parallel", "parallel", "arbitrary"),
            vmem_limit_bytes=vmem_limit),
    )(q, k, v)


def attention_forward(x, params, num_heads):
    """Forward pass of timm Attention (qkv_bias=False, qk_norm=False, p=0)."""
    B, N, C = x.shape
    D = C // num_heads
    scale = D ** (-0.5)
    tune = _tuning()

    x2d = x.reshape(B * N, C)
    w = params["w_qkv"]                                   # (C, 3C), stored (in, out)
    wq, wk, wv = w[:, :C], w[:, C:2 * C], w[:, 2 * C:]    # one-time small weight slices

    # QKV projection (q comes out pre-scaled).  Each output is (B*N, C).
    q2d, k2d, v2d = qkv_proj_pallas(
        x2d, wq, wk, wv, scale,
        tm_t=tune["tm_t"], vmem_limit=tune["vmem_limit"])

    # (B*N, C) -> (B, N, C) is a pure metadata reshape: no HBM traffic, no head transpose.
    q3 = q2d.reshape(B, N, C)
    k3 = k2d.reshape(B, N, C)
    v3 = v2d.reshape(B, N, C)
    # q_norm / k_norm are nn.Identity() (qk_norm=False default).

    o = flash_attention(q3, k3, v3, num_heads,
                        tq_t=tune["tq_t"], tkv_t=tune["tkv_t"],
                        vmem_limit=tune["vmem_limit"])    # (B, N, C), heads already merged

    out2d = linear_bias_pallas(o.reshape(B * N, C), params["w_proj"], params["b_proj"],
                               tm_t=tune["tm_t"], vmem_limit=tune["vmem_limit"])
    return out2d.reshape(B, N, C)


# ------------------------------ reference ----------------------------------

def attention_reference(x, params, num_heads):
    B, N, C = x.shape
    D = C // num_heads
    scale = D ** (-0.5)
    qkv = (x.reshape(B * N, C) @ params["w_qkv"]).reshape(B, N, 3, num_heads, D)
    qkv = jnp.transpose(qkv, (2, 0, 3, 1, 4))
    q, k, v = qkv[0], qkv[1], qkv[2]
    s = jnp.einsum("bhnd,bhmd->bhnm", q * scale, k)
    p = jax.nn.softmax(s, axis=-1)
    o = jnp.einsum("bhnm,bhmd->bhnd", p, v)
    o = jnp.transpose(o, (0, 2, 1, 3)).reshape(B * N, C)
    return (o @ params["w_proj"] + params["b_proj"]).reshape(B, N, C)


# -------------------------------- main --------------------------------------

if __name__ == "__main__":
    B, N, C = 2, 8, 32
    num_heads = 4  # head_dim = 8

    key = jax.random.PRNGKey(0)
    kx, kqkv, kp, kpb = jax.random.split(key, 4)

    x = jax.random.normal(kx, (B, N, C), dtype=jnp.float32)

    bound = (1.0 / C) ** 0.5
    params = {
        # weights stored as (in, out) so kernels do x @ w directly
        "w_qkv": jax.random.uniform(kqkv, (C, 3 * C), jnp.float32, -bound, bound),
        "w_proj": jax.random.uniform(kp, (C, C), jnp.float32, -bound, bound),
        "b_proj": jax.random.uniform(kpb, (C,), jnp.float32, -bound, bound),
    }

    out = attention_forward(x, params, num_heads)
    out = jax.block_until_ready(out)

    ref = attention_reference(x, params, num_heads)
    assert out.shape == (B, N, C)
    max_err = float(jnp.max(jnp.abs(out - ref)))
    assert jnp.allclose(out, ref, atol=1e-4, rtol=1e-4), max_err

    print("KERNEL_OK")
</pallas_src>

<mosaic_0001>
module attributes {stable_mosaic.version = 11 : i64} {
  func.func @_qkv_kernel(%arg0: i32, %arg1: i32, %arg2: i32, %arg3: memref<16x32xf32, #tpu.memory_space<vmem>>, %arg4: memref<32x32xf32, #tpu.memory_space<vmem>>, %arg5: memref<32x32xf32, #tpu.memory_space<vmem>>, %arg6: memref<32x32xf32, #tpu.memory_space<vmem>>, %arg7: memref<16x32xf32, #tpu.memory_space<vmem>>, %arg8: memref<16x32xf32, #tpu.memory_space<vmem>>, %arg9: memref<16x32xf32, #tpu.memory_space<vmem>>, %arg10: memref<16x32xf32, #tpu.memory_space<vmem>>, %arg11: memref<16x32xf32, #tpu.memory_space<vmem>>, %arg12: memref<16x32xf32, #tpu.memory_space<vmem>>) attributes {dimension_semantics = [#tpu.dimension_semantics<parallel>, #tpu.dimension_semantics<parallel>, #tpu.dimension_semantics<arbitrary>], iteration_bounds = array<i64: 1, 1, 1>, scalar_prefetch = 0 : i64, scratch_operands = 3 : i64, tpu.core_type = #tpu.core_type<tc>, window_params = [{transform_indices = @transform_0, window_bounds = array<i64: 16, 32>}, {transform_indices = @transform_1, window_bounds = array<i64: 32, 32>}, {transform_indices = @transform_2, window_bounds = array<i64: 32, 32>}, {transform_indices = @transform_3, window_bounds = array<i64: 32, 32>}, {transform_indices = @transform_4, window_bounds = array<i64: 16, 32>}, {transform_indices = @transform_5, window_bounds = array<i64: 16, 32>}, {transform_indices = @transform_6, window_bounds = array<i64: 16, 32>}]} {
    %c0_i32 = arith.constant 0 : i32
    %0 = arith.cmpi eq, %arg2, %c0_i32 : i32
    %1 = arith.extui %0 : i1 to i32
    %c0_i32_0 = arith.constant 0 : i32
    %2 = arith.cmpi ne, %1, %c0_i32_0 : i32
    scf.if %2 {
      %cst_24 = arith.constant 0.000000e+00 : f32
      %22 = vector.broadcast %cst_24 : f32 to vector<16x32xf32>
      %c0_25 = arith.constant 0 : index
      %c0_26 = arith.constant 0 : index
      %23 = vector.load %arg10[%c0_25, %c0_26] : memref<16x32xf32, #tpu.memory_space<vmem>>, vector<16x32xf32>
      tpu.vector_store %arg10[%c0_25, %c0_26], %22 {strides = array<i32>} : memref<16x32xf32, #tpu.memory_space<vmem>>, vector<16x32xf32>,
      %cst_27 = arith.constant 0.000000e+00 : f32
      %24 = vector.broadcast %cst_27 : f32 to vector<16x32xf32>
      %c0_28 = arith.constant 0 : index
      %c0_29 = arith.constant 0 : index
      %25 = vector.load %arg11[%c0_28, %c0_29] : memref<16x32xf32, #tpu.memory_space<vmem>>, vector<16x32xf32>
      tpu.vector_store %arg11[%c0_28, %c0_29], %24 {strides = array<i32>} : memref<16x32xf32, #tpu.memory_space<vmem>>, vector<16x32xf32>,
      %cst_30 = arith.constant 0.000000e+00 : f32
      %26 = vector.broadcast %cst_30 : f32 to vector<16x32xf32>
      %c0_31 = arith.constant 0 : index
      %c0_32 = arith.constant 0 : index
      %27 = vector.load %arg12[%c0_31, %c0_32] : memref<16x32xf32, #tpu.memory_space<vmem>>, vector<16x32xf32>
      tpu.vector_store %arg12[%c0_31, %c0_32], %26 {strides = array<i32>} : memref<16x32xf32, #tpu.memory_space<vmem>>, vector<16x32xf32>,
    } else {
    }
    %c0 = arith.constant 0 : index
    %c0_1 = arith.constant 0 : index
    %3 = vector.load %arg3[%c0, %c0_1] : memref<16x32xf32, #tpu.memory_space<vmem>>, vector<16x32xf32>
    %c0_2 = arith.constant 0 : index
    %c0_3 = arith.constant 0 : index
    %4 = vector.load %arg10[%c0_2, %c0_3] : memref<16x32xf32, #tpu.memory_space<vmem>>, vector<16x32xf32>
    %c0_4 = arith.constant 0 : index
    %c0_5 = arith.constant 0 : index
    %5 = vector.load %arg4[%c0_4, %c0_5] : memref<32x32xf32, #tpu.memory_space<vmem>>, vector<32x32xf32>
    %cst = arith.constant dense<0.000000e+00> : vector<16x32xf32>
    %6 = tpu.matmul %3, %5, %cst {dimension_numbers = #tpu.dot_dimension_numbers<[1], [0], [0], [1], [0, 0, 1, 1], [], []>} : vector<16x32xf32>, vector<32x32xf32>, vector<16x32xf32> -> vector<16x32xf32>
    %7 = arith.addf %4, %6 : vector<16x32xf32>
    %c0_6 = arith.constant 0 : index
    %c0_7 = arith.constant 0 : index
    %8 = vector.load %arg10[%c0_6, %c0_7] : memref<16x32xf32, #tpu.memory_space<vmem>>, vector<16x32xf32>
    tpu.vector_store %arg10[%c0_6, %c0_7], %7 {strides = array<i32>} : memref<16x32xf32, #tpu.memory_space<vmem>>, vector<16x32xf32>,
    %c0_8 = arith.constant 0 : index
    %c0_9 = arith.constant 0 : index
    %9 = vector.load %arg11[%c0_8, %c0_9] : memref<16x32xf32, #tpu.memory_space<vmem>>, vector<16x32xf32>
    %c0_10 = arith.constant 0 : index
    %c0_11 = arith.constant 0 : index
    %10 = vector.load %arg5[%c0_10, %c0_11] : memref<32x32xf32, #tpu.memory_space<vmem>>, vector<32x32xf32>
    %cst_12 = arith.constant dense<0.000000e+00> : vector<16x32xf32>
    %11 = tpu.matmul %3, %10, %cst_12 {dimension_numbers = #tpu.dot_dimension_numbers<[1], [0], [0], [1], [0, 0, 1, 1], [], []>} : vector<16x32xf32>, vector<32x32xf32>, vector<16x32xf32> -> vector<16x32xf32>
    %12 = arith.addf %9, %11 : vector<16x32xf32>
    %c0_13 = arith.constant 0 : index
    %c0_14 = arith.constant 0 : index
    %13 = vector.load %arg11[%c0_13, %c0_14] : memref<16x32xf32, #tpu.memory_space<vmem>>, vector<16x32xf32>
    tpu.vector_store %arg11[%c0_13, %c0_14], %12 {strides = array<i32>} : memref<16x32xf32, #tpu.memory_space<vmem>>, vector<16x32xf32>,
    %c0_15 = arith.constant 0 : index
    %c0_16 = arith.constant 0 : index
    %14 = vector.load %arg12[%c0_15, %c0_16] : memref<16x32xf32, #tpu.memory_space<vmem>>, vector<16x32xf32>
    %c0_17 = arith.constant 0 : index
    %c0_18 = arith.constant 0 : index
    %15 = vector.load %arg6[%c0_17, %c0_18] : memref<32x32xf32, #tpu.memory_space<vmem>>, vector<32x32xf32>
    %cst_19 = arith.constant dense<0.000000e+00> : vector<16x32xf32>
    %16 = tpu.matmul %3, %15, %cst_19 {dimension_numbers = #tpu.dot_dimension_numbers<[1], [0], [0], [1], [0, 0, 1, 1], [], []>} : vector<16x32xf32>, vector<32x32xf32>, vector<16x32xf32> -> vector<16x32xf32>
    %17 = arith.addf %14, %16 : vector<16x32xf32>
    %c0_20 = arith.constant 0 : index
    %c0_21 = arith.constant 0 : index
    %18 = vector.load %arg12[%c0_20, %c0_21] : memref<16x32xf32, #tpu.memory_space<vmem>>, vector<16x32xf32>
    tpu.vector_store %arg12[%c0_20, %c0_21], %17 {strides = array<i32>} : memref<16x32xf32, #tpu.memory_space<vmem>>, vector<16x32xf32>,
    %c0_i32_22 = arith.constant 0 : i32
    %19 = arith.cmpi eq, %arg2, %c0_i32_22 : i32
    %20 = arith.extui %19 : i1 to i32
    %c0_i32_23 = arith.constant 0 : i32
    %21 = arith.cmpi ne, %20, %c0_i32_23 : i32
    scf.if %21 {
      %c0_24 = arith.constant 0 : index
      %c0_25 = arith.constant 0 : index
      %22 = vector.load %arg10[%c0_24, %c0_25] : memref<16x32xf32, #tpu.memory_space<vmem>>, vector<16x32xf32>
      %cst_26 = arith.constant 0.353553385 : f32
      %23 = vector.broadcast %cst_26 : f32 to vector<16x32xf32>
      %24 = arith.mulf %22, %23 : vector<16x32xf32>
      %c0_27 = arith.constant 0 : index
      %c0_28 = arith.constant 0 : index
      %25 = vector.load %arg7[%c0_27, %c0_28] : memref<16x32xf32, #tpu.memory_space<vmem>>, vector<16x32xf32>
      tpu.vector_store %arg7[%c0_27, %c0_28], %24 {strides = array<i32>} : memref<16x32xf32, #tpu.memory_space<vmem>>, vector<16x32xf32>,
      %c0_29 = arith.constant 0 : index
      %c0_30 = arith.constant 0 : index
      %26 = vector.load %arg11[%c0_29, %c0_30] : memref<16x32xf32, #tpu.memory_space<vmem>>, vector<16x32xf32>
      %c0_31 = arith.constant 0 : index
      %c0_32 = arith.constant 0 : index
      %27 = vector.load %arg8[%c0_31, %c0_32] : memref<16x32xf32, #tpu.memory_space<vmem>>, vector<16x32xf32>
      tpu.vector_store %arg8[%c0_31, %c0_32], %26 {strides = array<i32>} : memref<16x32xf32, #tpu.memory_space<vmem>>, vector<16x32xf32>,
      %c0_33 = arith.constant 0 : index
      %c0_34 = arith.constant 0 : index
      %28 = vector.load %arg12[%c0_33, %c0_34] : memref<16x32xf32, #tpu.memory_space<vmem>>, vector<16x32xf32>
      %c0_35 = arith.constant 0 : index
      %c0_36 = arith.constant 0 : index
      %29 = vector.load %arg9[%c0_35, %c0_36] : memref<16x32xf32, #tpu.memory_space<vmem>>, vector<16x32xf32>
      tpu.vector_store %arg9[%c0_35, %c0_36], %28 {strides = array<i32>} : memref<16x32xf32, #tpu.memory_space<vmem>>, vector<16x32xf32>,
    } else {
    }
    return
  }
  func.func @transform_0(%arg0: i32, %arg1: i32, %arg2: i32) -> (i32, i32) {
    %c0_i32 = arith.constant 0 : i32
    return %arg0, %arg2 : i32, i32
  }
  func.func @transform_1(%arg0: i32, %arg1: i32, %arg2: i32) -> (i32, i32) {
    %c0_i32 = arith.constant 0 : i32
    return %arg2, %arg1 : i32, i32
  }
  func.func @transform_2(%arg0: i32, %arg1: i32, %arg2: i32) -> (i32, i32) {
    %c0_i32 = arith.constant 0 : i32
    return %arg2, %arg1 : i32, i32
  }
  func.func @transform_3(%arg0: i32, %arg1: i32, %arg2: i32) -> (i32, i32) {
    %c0_i32 = arith.constant 0 : i32
    return %arg2, %arg1 : i32, i32
  }
  func.func @transform_4(%arg0: i32, %arg1: i32, %arg2: i32) -> (i32, i32) {
    %c0_i32 = arith.constant 0 : i32
    return %arg0, %arg1 : i32, i32
  }
  func.func @transform_5(%arg0: i32, %arg1: i32, %arg2: i32) -> (i32, i32) {
    %c0_i32 = arith.constant 0 : i32
    return %arg0, %arg1 : i32, i32
  }
  func.func @transform_6(%arg0: i32, %arg1: i32, %arg2: i32) -> (i32, i32) {
    %c0_i32 = arith.constant 0 : i32
    return %arg0, %arg1 : i32, i32
  }
}

</mosaic_0001>

<bundles_post_ra>
// kernel: tpu_custom_call.1
= control target key start
LH: loop header
LB: loop body
LE: loop exit
PB: predicated region body
PF: predicated region fallthrough
CT: control target
= control target key end

     0   :  { %12 = vsyncpa [#allocation6], 0  ;;  %s872_s0 = inlined_call_operand.hbm [shape: f32[16,32], index: 0, kind: input, shape index: {}]   ;;  %s873_s1 = inlined_call_operand.hbm [shape: f32[32,32], index: 1, kind: input, shape index: {}]   ;;  %s874_s2 = inlined_call_operand.hbm [shape: f32[32,32], index: 2, kind: input, shape index: {}]   ;;  %s875_s3 = inlined_call_operand.hbm [shape: f32[32,32], index: 3, kind: input, shape index: {}]   ;;  %s876_s4 = inlined_call_operand.hbm [shape: f32[16,32], index: 4, kind: output, shape index: {0}]   ;;  %s877_s5 = inlined_call_operand.hbm [shape: f32[16,32], index: 5, kind: output, shape index: {1}]   ;;  %s878_s6 = inlined_call_operand.hbm [shape: f32[16,32], index: 6, kind: output, shape index: {2}]  }
   0x1   :  { %13 = vsyncpa [#allocation9], 0 }
   0x2   :  { %14 = vsyncpa [#allocation12], 0 }
   0x3   :  { %15 = vsyncpa [#allocation7], 0 }
   0x4   :  { %16 = vsyncpa [#allocation15], 0  ;;  %s674_s21 = smov [#allocation8]   ;;  %s675_s23 = smov [#allocation5]  }
   0x5   :  { %s34_s22 = sshll.u32 %s674_s21, 4  ;;  %s22_s24 = sshll.u32 %s675_s23, 4  ;;  %s35_s22 = int_to_ptr.vmem [resolvable:$true] %s34_s22  ;;  %s719_s24 = int_to_ptr.vmem [resolvable:$true] %s22_s24 }
   0x6   :  { %s510_s27 = scalar_lea.hbm %s873_s1, 512 }
   0x7   :  { %p511_p0 = scmp.ne.s32.totalorder %s873_s1, %s510_s27  ;;  %p514_p1 = scmp.lt.u32.totalorder %s510_s27, %s873_s1 }
   0x9   :  { %p516_p2 = pnand %p514_p1, %p511_p0 }
   0xb   :  { %519 = shalt.err (!%p516_p2)
}
   0xc   :  { %s520_s8 = scalar_lea.vmem %s35_s22, 512  ;;  %p525_p4 = scmp.lt.s32.totalorder %s35_s22, %s35_s22 }
   0xd   :  { %p521_p3 = scmp.ne.s32.totalorder %s35_s22, %s520_s8  ;;  %p526_p5 = scmp.lt.s32.totalorder %s520_s8, %s520_s8 }
   0xf   :  { %p527_p6 = por %p526_p5, %p525_p4 }
  0x11   :  { %p528_p7 = pnand %p527_p6, %p521_p3 }
  0x13   :  { %531 = shalt.err (!%p528_p7)
}
  0x14   :  { %s676_s9 = smov 128   ;;  %s677_s10 = smov 8  }
  0x15   :  { %40 = dma.hbm_to_vmem [thread:$0]  %s873_s1, 512, %s35_s22, [#allocation9], %s676_s9, %s676_s9, %s677_s10  }
  0x16   :  { %s532_s15 = scalar_lea.hbm %s872_s0, 256 }
  0x17   :  { %p533_p8 = scmp.ne.s32.totalorder %s872_s0, %s532_s15  ;;  %p536_p9 = scmp.lt.u32.totalorder %s532_s15, %s872_s0 }
  0x19   :  { %p538_p10 = pnand %p536_p9, %p533_p8 }
  0x1b   :  { %541 = shalt.err (!%p538_p10)
}
  0x1c   :  { %s542_s20 = scalar_lea.vmem %s719_s24, 256  ;;  %p547_p12 = scmp.lt.s32.totalorder %s719_s24, %s719_s24 }
  0x1d   :  { %p543_p11 = scmp.ne.s32.totalorder %s719_s24, %s542_s20  ;;  %p548_p13 = scmp.lt.s32.totalorder %s542_s20, %s542_s20 }
  0x1f   :  { %p549_p0 = por %p548_p13, %p547_p12 }
  0x21   :  { %p550_p1 = pnand %p549_p0, %p543_p11 }
  0x23   :  { %553 = shalt.err (!%p550_p1)
}
  0x24   :  { %28 = dma.hbm_to_vmem [thread:$0]  %s872_s0, 256, %s719_s24, [#allocation6], %s676_s9, %s676_s9, %s677_s10  }
  0x25   :  { %s678_s22 = smov [#allocation10]   ;;  %s679_s25 = smov [#allocation11]  }
  0x26   :  { %s46_s23 = sshll.u32 %s678_s22, 4  ;;  %s58_s26 = sshll.u32 %s679_s25, 4  ;;  %s47_s23 = int_to_ptr.vmem [resolvable:$true] %s46_s23  ;;  %s756_s26 = int_to_ptr.vmem [resolvable:$true] %s58_s26 }
  0x27   :  { %s554_s29 = scalar_lea.hbm %s874_s2, 512 }
  0x28   :  { %p555_p2 = scmp.ne.s32.totalorder %s874_s2, %s554_s29  ;;  %p558_p3 = scmp.lt.u32.totalorder %s554_s29, %s874_s2 }
  0x2a   :  { %p560_p4 = pnand %p558_p3, %p555_p2 }
  0x2c   :  { %563 = shalt.err (!%p560_p4)
}
  0x2d   :  { %s564_s0 = scalar_lea.vmem %s47_s23, 512  ;;  %p569_p6 = scmp.lt.s32.totalorder %s47_s23, %s47_s23 }
  0x2e   :  { %p565_p5 = scmp.ne.s32.totalorder %s47_s23, %s564_s0  ;;  %p570_p7 = scmp.lt.s32.totalorder %s564_s0, %s564_s0 }
  0x30   :  { %p571_p8 = por %p570_p7, %p569_p6 }
  0x32   :  { %p572_p9 = pnand %p571_p8, %p565_p5 }
  0x34   :  { %575 = shalt.err (!%p572_p9)
}
  0x35   :  { %52 = dma.hbm_to_vmem [thread:$0]  %s874_s2, 512, %s47_s23, [#allocation9], %s676_s9, %s676_s9, %s677_s10  }
  0x36   :  { %s576_s15 = scalar_lea.hbm %s875_s3, 512 }
  0x37   :  { %p577_p10 = scmp.ne.s32.totalorder %s875_s3, %s576_s15  ;;  %p580_p11 = scmp.lt.u32.totalorder %s576_s15, %s875_s3 }
  0x39   :  { %p582_p12 = pnand %p580_p11, %p577_p10 }
  0x3b   :  { %585 = shalt.err (!%p582_p12)
}
  0x3c   :  { %s586_s20 = scalar_lea.vmem %s756_s26, 512  ;;  %p591_p0 = scmp.lt.s32.totalorder %s756_s26, %s756_s26 }
  0x3d   :  { %p587_p13 = scmp.ne.s32.totalorder %s756_s26, %s586_s20  ;;  %p592_p1 = scmp.lt.s32.totalorder %s586_s20, %s586_s20 }
  0x3f   :  { %p593_p2 = por %p592_p1, %p591_p0 }
  0x41   :  { %p594_p3 = pnand %p593_p2, %p587_p13 }
  0x43   :  { %597 = shalt.err (!%p594_p3)
}
  0x44   :  { %64 = dma.hbm_to_vmem [thread:$0]  %s875_s3, 512, %s756_s26, [#allocation12], %s676_s9, %s676_s9, %s677_s10  }
  0x45   :  { %664 = dma.done.wait [#allocation6], 256  }
  0x46   :  { %665 = vsyncadd [#allocation6], 4294967040 }
  0x47   :  { %666 = dma.done.wait [#allocation9], 1024  }
  0x48   :  { %667 = vsyncadd [#allocation9], 4294966272 }
  0x49   :  { %668 = dma.done.wait [#allocation12], 512  }
  0x4a   :  { %669 = vsyncadd [#allocation12], 4294966784  ;;  %vm81_vm0 = vcmask 261120   ;;  %v680_v0 = vmov 0.0   ;;  %v92_v1 = vld [vmem:[#allocation8] sm:$0xff]  ;;  %v93_v2 = vld [vmem:[#allocation8 + $0x8] sm:$0xff] }
  0x4b   :  { %83 = vst.msk [vmem:[#allocation2 + $0x8] sm:$0xff] %vm81_vm0, %v680_v0  ;;  %82 = vst.msk [vmem:[#allocation2] sm:$0xff] %vm81_vm0, %v680_v0  ;;  %v94_v3 = vld [vmem:[#allocation8 + $0x10] sm:$0xff]  ;;  %v476_v4 = vpack.c.bf16 %v93_v2, %v92_v1  ;;  %v95_v5 = vld [vmem:[#allocation8 + $0x18] sm:$0xff]  ;;  %s681_s3 = smov [#allocation14]   ;;  %s682_s22 = smov [#allocation13]  }
  0x4c   :  { %84 = vst.msk [vmem:[#allocation3] sm:$0xff] %vm81_vm0, %v680_v0  ;;  %85 = vst.msk [vmem:[#allocation3 + $0x8] sm:$0xff] %vm81_vm0, %v680_v0  ;;  %v184_v6 = vld [vmem:[#allocation10] sm:$0xff]  ;;  %v185_v7 = vld [vmem:[#allocation10 + $0x8] sm:$0xff]  ;;  %v480_v8 = vpack.c.bf16 %v95_v5, %v94_v3  ;;  %s386_s21 = sshll.u32 %s681_s3, 4  ;;  %s374_s23 = sshll.u32 %s682_s22, 4  ;;  %s387_s21 = int_to_ptr.vmem [resolvable:$true] %s386_s21  ;;  %s812_s23 = int_to_ptr.vmem [resolvable:$true] %s374_s23 }
  0x4d   :  { %86 = vst.msk [vmem:[#allocation4] sm:$0xff] %vm81_vm0, %v680_v0  ;;  %87 = vst.msk [vmem:[#allocation4 + $0x8] sm:$0xff] %vm81_vm0, %v680_v0  ;;  %v484_v9 = vpack.c.bf16 %v185_v7, %v184_v6  ;;  %v88_v10 = vld [vmem:[#allocation5] sm:$0xff]  ;;  %v269_v11 = vld [vmem:[#allocation11] sm:$0xff]  ;;  %477 = vmatprep.subr.bf16.mxu0 %v476_v4  ;;  %s683_s25 = smov [#allocation16]   ;;  %s598_s27 = scalar_lea.vmem %s387_s21, 256 }
  0x4e   :  { %451 = vmatprep.mubr.msk.f32.mxu0 %vm81_vm0, %v88_v10  ;;  %v270_v12 = vld [vmem:[#allocation11 + $0x8] sm:$0xff]  ;;  %v186_v13 = vld [vmem:[#allocation10 + $0x10] sm:$0xff]  ;;  %v187_v14 = vld [vmem:[#allocation10 + $0x18] sm:$0xff]  ;;  %479 = vmatpush3.bf16.msra.mxu0 %v476_v4  ;;  %s816_s26 = sshll.u32 %s683_s25, 4  ;;  %p599_p4 = scmp.ne.s32.totalorder %s387_s21, %s598_s27  ;;  %s399_s26 = int_to_ptr.vmem [resolvable:$true] %s816_s26 }
  0x4f   :  { %485 = vmatprep.subr.bf16.mxu1 %v484_v9  ;;  %v488_v15 = vpack.c.bf16 %v187_v14, %v186_v13  ;;  %481 = vmatprep.subr.bf16.mxu0 %v480_v8  ;;  %v492_v16 = vpack.c.bf16 %v270_v12, %v269_v11  ;;  %v271_v17 = vld [vmem:[#allocation11 + $0x10] sm:$0xff]  ;;  %v272_v18 = vld [vmem:[#allocation11 + $0x18] sm:$0xff]  ;;  %p603_p5 = scmp.lt.s32.totalorder %s387_s21, %s387_s21  ;;  %p604_p6 = scmp.lt.s32.totalorder %s598_s27, %s598_s27 }
  0x50   :  { %487 = vmatpush3.bf16.msra.mxu1 %v484_v9  ;;  %462 = vmatprep.mubr.msk.f32.mxu1 %vm81_vm0, %v88_v10  ;;  %v89_v19 = vld [vmem:[#allocation5 + $0x8] sm:$0xff]  ;;  %v496_v20 = vpack.c.bf16 %v272_v18, %v271_v17 }
  0x51   :  { %489 = vmatprep.subr.bf16.mxu1 %v488_v15  ;;  %p605_p7 = por %p604_p6, %p603_p5 }
  0x52   :  { %483 = vmatpush3.bf16.msra.mxu0 %v480_v8  ;;  %v91_v21 = vld [vmem:[#allocation2 + $0x8] sm:$0xff]  ;;  %v90_v22 = vld [vmem:[#allocation2] sm:$0xff] }
  0x53   :  { %493 = vmatprep.subr.bf16.mxu0 %v492_v16  ;;  %v183_v23 = vld [vmem:[#allocation3 + $0x8] sm:$0xff]  ;;  %v182_v25 = vld [vmem:[#allocation3] sm:$0xff]  ;;  %p606_p8 = pnand %p605_p7, %p599_p4 }
  0x54   :  { %491 = vmatpush3.bf16.msra.mxu1 %v488_v15  ;;  %v268_v33 = vld [vmem:[#allocation4 + $0x8] sm:$0xff]  ;;  %v267_v34 = vld [vmem:[#allocation4] sm:$0xff] }
  0x55   :  { %452 = vmatmul.mubr.msk.f32.vlgmr.msra.gmra.mrb[0].mxu0 %vm81_vm0, %v89_v19 }
  0x56   :  { %495 = vmatpush3.bf16.msra.mxu0 %v492_v16  ;;  %473 = vmatprep.mubr.msk.f32.mxu0 %vm81_vm0, %v88_v10 }
  0x57   :  { %463 = vmatmul.mubr.msk.f32.vlgmr.msra.gmra.mrb[0].mxu1 %vm81_vm0, %v89_v19  ;;  %497 = vmatprep.subr.bf16.mxu0 %v496_v20 }
  0x5a   :  { %499 = vmatpush3.bf16.msra.mxu0 %v496_v20 }
  0x5d   :  { %474 = vmatmul.mubr.msk.f32.vlgmr.msra.gmra.mrb[2].mxu0 %vm81_vm0, %v89_v19 }
 0x128   :  { %v453_v24 = vpop.f32.mrb[0].mxu0 }
 0x129   :  { %v179_v26 = vadd.f32 %v453_v24, %v91_v21  ;;  %v169_v27 = vpop.f32.mrb[1].mxu0 }
 0x12a   :  { %v464_v28 = vpop.f32.mrb[0].mxu1  ;;  %v178_v29 = vadd.f32 %v169_v27, %v90_v22 }
 0x12b   :  { %v264_v30 = vadd.f32 %v464_v28, %v183_v23  ;;  %v254_v31 = vpop.f32.mrb[1].mxu1  ;;  %181 = vst.msk [vmem:[#allocation2 + $0x8] sm:$0xff] %vm81_vm0, %v179_v26 }
 0x12c   :  { %v263_v32 = vadd.f32 %v254_v31, %v182_v25  ;;  %180 = vst.msk [vmem:[#allocation2] sm:$0xff] %vm81_vm0, %v178_v29 }
 0x12d   :  { %266 = vst.msk [vmem:[#allocation3 + $0x8] sm:$0xff] %vm81_vm0, %v264_v30 }
 0x12e   :  { %265 = vst.msk [vmem:[#allocation3] sm:$0xff] %vm81_vm0, %v263_v32 }
 0x130   :  { %v475_v35 = vpop.f32.mrb[2].mxu0 }
 0x131   :  { %v349_v36 = vadd.f32 %v475_v35, %v268_v33  ;;  %v339_v37 = vpop.f32.mrb[3].mxu0 }
 0x132   :  { %v348_v38 = vadd.f32 %v339_v37, %v267_v34  ;;  %v356_v39 = vld [vmem:[#allocation2 + $0x8] sm:$0xff] }
 0x133   :  { %351 = vst.msk [vmem:[#allocation4 + $0x8] sm:$0xff] %vm81_vm0, %v349_v36  ;;  %v355_v41 = vld [vmem:[#allocation2] sm:$0xff]  ;;  %v358_v42 = vmul.f32 0.35355338, %v356_v39 }
 0x134   :  { %v362_v40 = vld [vmem:[#allocation3 + $0x8] sm:$0xff]  ;;  %350 = vst.msk [vmem:[#allocation4] sm:$0xff] %vm81_vm0, %v348_v38  ;;  %v357_v44 = vmul.f32 0.35355338, %v355_v41 }
 0x135   :  { %v361_v43 = vld [vmem:[#allocation3] sm:$0xff]  ;;  %364 = vst.msk [vmem:[#allocation14 + $0x8] sm:$0xff] %vm81_vm0, %v362_v40  ;;  %360 = vst.msk [vmem:[#allocation13 + $0x8] sm:$0xff] %vm81_vm0, %v358_v42 }
 0x136   :  { %363 = vst.msk [vmem:[#allocation14] sm:$0xff] %vm81_vm0, %v361_v43 }
 0x137   :  { %609 = shalt.err (!%p606_p8)
}
 0x138   :  { %s610_s30 = scalar_lea.hbm %s877_s5, 256 }
 0x139   :  { %p611_p9 = scmp.ne.s32.totalorder %s877_s5, %s610_s30  ;;  %p614_p10 = scmp.lt.u32.totalorder %s610_s30, %s877_s5 }
 0x13b   :  { %p616_p11 = pnand %p614_p10, %p611_p9 }
 0x13d   :  { %619 = shalt.err (!%p616_p11)
}
 0x13e   :  { %392 = dma.vmem_to_hbm [thread:$0]  %s387_s21, 256, %s877_s5, [#allocation15], %s676_s9, %s676_s9, %s677_s10   ;;  %359 = vst.msk [vmem:[#allocation13] sm:$0xff] %vm81_vm0, %v357_v44 }
 0x13f   :  { %s620_s13 = scalar_lea.vmem %s812_s23, 256  ;;  %p625_p13 = scmp.lt.s32.totalorder %s812_s23, %s812_s23 }
 0x140   :  { %p621_p12 = scmp.ne.s32.totalorder %s812_s23, %s620_s13  ;;  %p626_p0 = scmp.lt.s32.totalorder %s620_s13, %s620_s13 }
 0x142   :  { %p627_p1 = por %p626_p0, %p625_p13 }
 0x144   :  { %p628_p2 = pnand %p627_p1, %p621_p12 }
 0x146   :  { %631 = shalt.err (!%p628_p2)
}
 0x147   :  { %s632_s16 = scalar_lea.hbm %s876_s4, 256 }
 0x148   :  { %p633_p3 = scmp.ne.s32.totalorder %s876_s4, %s632_s16  ;;  %p636_p4 = scmp.lt.u32.totalorder %s632_s16, %s876_s4 }
 0x14a   :  { %p638_p5 = pnand %p636_p4, %p633_p3 }
 0x14c   :  { %641 = shalt.err (!%p638_p5)
}
 0x14d   :  { %380 = dma.vmem_to_hbm [thread:$0]  %s812_s23, 256, %s876_s4, [#allocation7], %s676_s9, %s676_s9, %s677_s10   ;;  %v366_v45 = vld [vmem:[#allocation4 + $0x8] sm:$0xff]  ;;  %v365_v46 = vld [vmem:[#allocation4] sm:$0xff] }
 0x14e   :  { %368 = vst.msk [vmem:[#allocation16 + $0x8] sm:$0xff] %vm81_vm0, %v366_v45  ;;  %367 = vst.msk [vmem:[#allocation16] sm:$0xff] %vm81_vm0, %v365_v46  ;;  %s642_s1 = scalar_lea.vmem %s399_s26, 256  ;;  %p647_p7 = scmp.lt.s32.totalorder %s399_s26, %s399_s26 }
 0x14f   :  { %p643_p6 = scmp.ne.s32.totalorder %s399_s26, %s642_s1  ;;  %p648_p8 = scmp.lt.s32.totalorder %s642_s1, %s642_s1 }
 0x151   :  { %p649_p9 = por %p648_p8, %p647_p7 }
 0x153   :  { %p650_p10 = pnand %p649_p9, %p643_p6 }
 0x155   :  { %653 = shalt.err (!%p650_p10)
}
 0x156   :  { %s654_s22 = scalar_lea.hbm %s878_s6, 256 }
 0x157   :  { %p655_p11 = scmp.ne.s32.totalorder %s878_s6, %s654_s22  ;;  %p658_p12 = scmp.lt.u32.totalorder %s654_s22, %s878_s6 }
 0x159   :  { %p660_p13 = pnand %p658_p12, %p655_p11 }
 0x15b   :  { %663 = shalt.err (!%p660_p13)
}
 0x15c   :  { %404 = dma.vmem_to_hbm [thread:$0]  %s399_s26, 256, %s878_s6, [#allocation15], %s676_s9, %s676_s9, %s677_s10  }
 0x15d   :  { %670 = dma.done.wait [#allocation7], 256  }
 0x15e   :  { %671 = vsyncadd [#allocation7], 4294967040 }
 0x15f   :  { %672 = dma.done.wait [#allocation15], 512  }
 0x160   :  { %673 = vsyncadd [#allocation15], 4294966784 }
 0x161   :  { %414 = vsyncpa [#allocation6], 1 }
 0x162   :  { %415 = vsyncpa [#allocation9], 1 }
 0x163   :  { %416 = vsyncpa [#allocation12], 1 }
 0x164   :  { %417 = vsyncpa [#allocation7], 1 }
 0x165   :  { %418 = vsyncpa [#allocation15], 1 }

</bundles_post_ra>
